<compile_context>
chip_gen: v5e
topology: v5e:2x2
jax: 0.10.0
libtpu: 0.0.40
codegen_flags: <defaults>
</compile_context>

<pallas_src>
import functools

import jax
import jax.numpy as jnp
from jax.experimental import pallas as pl
from jax.experimental.pallas import tpu as pltpu

BN_EPS = 1e-5
LANE = 128
TILE_TARGET = 512  # tile-size sweep sweet spot; always a multiple of 128 lanes


def _round_up(x, m):
    return (x + m - 1) // m * m


def _pad_to(a, shape):
    pads = [(0, t - s) for s, t in zip(a.shape, shape)]
    return jnp.pad(a, pads)


def _pick_tile(dim_p, target=TILE_TARGET):
    """Largest multiple of 128 that divides dim_p (itself a multiple of 128) <= target."""
    t = min(dim_p, target)
    while dim_p % t:
        t -= LANE
    return t


# ---------------------------------------------------------------------------
# Kernels. Grid = (N tiles, K tiles); K is the reduction axis (last, "arbitrary").
# acc_ref is a VMEM f32 accumulator resident across the K axis.
# ---------------------------------------------------------------------------
def _hidden_layer_kernel(x_ref, w_ref, g_ref, b_ref, o_ref, acc_ref, *, inv_n):
    k = pl.program_id(1)

    @pl.when(k == 0)
    def _():
        acc_ref[...] = jnp.zeros_like(acc_ref)

    acc_ref[...] += jnp.dot(x_ref[...], w_ref[...],
                            preferred_element_type=jnp.float32)

    @pl.when(k == pl.num_programs(1) - 1)
    def _():
        y = acc_ref[...]
        # Single-pass train-mode BN stats over the full (un-tiled) batch axis:
        # sum and sum-of-squares -> mean / biased variance.
        s1 = jnp.sum(y, axis=0, keepdims=True)
        s2 = jnp.sum(y * y, axis=0, keepdims=True)
        mean = s1 * inv_n
        var = jnp.maximum(s2 * inv_n - mean * mean, 0.0)  # clamp cancellation noise
        scale = g_ref[...] * jax.lax.rsqrt(var + BN_EPS)   # rsqrt -> EUP (free slot)
        shift = b_ref[...] - mean * scale
        # BN folded to scale+shift, then ReLU; store bf16 for the next layer's MXU.
        o_ref[...] = jnp.maximum(y * scale + shift, 0.0).astype(o_ref.dtype)


def _final_layer_kernel(x_ref, w_ref, b_ref, o_ref, acc_ref):
    k = pl.program_id(1)

    @pl.when(k == 0)
    def _():
        acc_ref[...] = jnp.zeros_like(acc_ref)

    acc_ref[...] += jnp.dot(x_ref[...], w_ref[...],
                            preferred_element_type=jnp.float32)

    @pl.when(k == pl.num_programs(1) - 1)
    def _():
        o_ref[...] = (acc_ref[...] + b_ref[...]).astype(o_ref.dtype)


# ---------------------------------------------------------------------------
# One fused layer call: (N parallel) x (K reduction) grid, pipelined BlockSpecs.
# ---------------------------------------------------------------------------
def _layer_call(kernel, h, w, extras, out_dtype):
    m, k_p = h.shape
    _, n_p = w.shape
    tk = _pick_tile(k_p)
    tn = _pick_tile(n_p)
    grid = (n_p // tn, k_p // tk)

    extra_specs = [pl.BlockSpec((1, tn), lambda n, k: (0, n)) for _ in extras]

    # VMEM budget: double-buffered x / w / per-feature vectors / output blocks
    # plus the f32 accumulator; generous headroom, capped at v7x physical (64 MiB).
    blk_bytes = (m * tk * h.dtype.itemsize
                 + tk * tn * w.dtype.itemsize
                 + len(extras) * tn * 4
                 + m * tn * jnp.dtype(out_dtype).itemsize)
    vmem_bytes = 2 * blk_bytes + m * tn * 4
    vmem_limit = int(min(64 << 20, max(4 * vmem_bytes, 16 << 20)))

    return pl.pallas_call(
        kernel,
        out_shape=jax.ShapeDtypeStruct((m, n_p), out_dtype),
        grid_spec=pltpu.PrefetchScalarGridSpec(
            num_scalar_prefetch=0,
            grid=grid,
            in_specs=[pl.BlockSpec((m, tk), lambda n, k: (0, k)),
                      pl.BlockSpec((tk, tn), lambda n, k: (k, n)),
                      *extra_specs],
            out_specs=pl.BlockSpec((m, tn), lambda n, k: (0, n)),
            scratch_shapes=[pltpu.VMEM((m, tn), jnp.float32)]),
        compiler_params=pltpu.CompilerParams(
            dimension_semantics=("parallel", "arbitrary"),
            vmem_limit_bytes=vmem_limit),
    )(h, w, *extras)


# ---------------------------------------------------------------------------
# Parameter init / packing
# ---------------------------------------------------------------------------
def init_mlp_params(key, layer_dim):
    """Unpadded f32 parameters mirroring the PyTorch module (W stored as [D_in, D_out])."""
    num_layers = len(layer_dim) - 1
    params = []
    for l in range(num_layers):
        key, kw, kb = jax.random.split(key, 3)
        d_in, d_out = layer_dim[l], layer_dim[l + 1]
        bound = 1.0 / jnp.sqrt(d_in)
        layer = {
            "w": jax.random.uniform(kw, (d_in, d_out), jnp.float32, -bound, bound),
            "b": jax.random.uniform(kb, (1, d_out), jnp.float32, -bound, bound),
        }
        if l != num_layers - 1:
            layer["gamma"] = jnp.ones((1, d_out), jnp.float32)
            layer["beta"] = jnp.zeros((1, d_out), jnp.float32)
        params.append(layer)
    return params


def pad_and_pack_params(params):
    """Pad feature dims to 128-lane multiples, cast weights to bf16.

    Padded-lane invariant: padded weight rows/cols and padded gamma/beta/bias lanes
    are all exactly zero (jnp.pad), so padded features stay exactly zero through
    matmul, BN (gamma=0 suppresses rsqrt(eps)) and ReLU in every layer.
    Hidden-layer Linear bias is dropped: it cancels exactly inside train-mode BN.
    """
    num_layers = len(params)
    packed = []
    for l, p in enumerate(params):
        d_in, d_out = p["w"].shape
        d_in_p, d_out_p = _round_up(d_in, LANE), _round_up(d_out, LANE)
        entry = {"w": _pad_to(p["w"], (d_in_p, d_out_p)).astype(jnp.bfloat16)}
        if l != num_layers - 1:
            entry["gamma"] = _pad_to(p["gamma"], (1, d_out_p))
            entry["beta"] = _pad_to(p["beta"], (1, d_out_p))
        else:
            entry["b"] = _pad_to(p["b"], (1, d_out_p))
        packed.append(entry)
    return packed


# ---------------------------------------------------------------------------
# Forward
# ---------------------------------------------------------------------------
@functools.partial(jax.jit, static_argnames=("out_dim",))
def mlp_forward(x, packed_params, *, out_dim):
    n, _ = x.shape
    d_in_p = packed_params[0]["w"].shape[0]
    # bf16 input in the wrapper: halves x's HBM->VMEM DMA; MXU consumes bf16 anyway.
    h = _pad_to(x, (n, d_in_p)).astype(jnp.bfloat16)
    inv_n = 1.0 / n  # true batch size (batch is never padded/tiled -> exact BN stats)
    num_layers = len(packed_params)
    for l in range(num_layers - 1):
        p = packed_params[l]
        h = _layer_call(
            functools.partial(_hidden_layer_kernel, inv_n=inv_n),
            h, p["w"], (p["gamma"], p["beta"]), jnp.bfloat16)
    p = packed_params[-1]
    out_p = _layer_call(_final_layer_kernel, h, p["w"], (p["b"],), jnp.float32)
    return out_p[:, :out_dim]


def mlp_reference(x, params):
    """Plain-JAX reference with the same numerics (bf16 matmul inputs, f32 accum,
    bf16 activations between layers; full Linear bias kept — it cancels in BN)."""
    num_layers = len(params)
    h = x.astype(jnp.bfloat16)
    for l in range(num_layers - 1):
        p = params[l]
        y = jnp.dot(h, p["w"].astype(jnp.bfloat16),
                    preferred_element_type=jnp.float32) + p["b"]
        mean = jnp.mean(y, axis=0, keepdims=True)
        var = jnp.mean(jnp.square(y - mean), axis=0, keepdims=True)
        y = (y - mean) * jax.lax.rsqrt(var + BN_EPS) * p["gamma"] + p["beta"]
        h = jnp.maximum(y, 0.0).astype(jnp.bfloat16)
    p = params[-1]
    return jnp.dot(h, p["w"].astype(jnp.bfloat16),
                   preferred_element_type=jnp.float32) + p["b"]


if __name__ == "__main__":
    layer_dim = [4, 32, 32, 8]  # input dim 4, two hidden layers of 32, output dim 8
    batch = 8

    key = jax.random.PRNGKey(0)
    key, kx = jax.random.split(key)
    x = jax.random.normal(kx, (batch, layer_dim[0]), jnp.float32)

    params = init_mlp_params(key, layer_dim)
    packed = pad_and_pack_params(params)

    out = mlp_forward(x, packed, out_dim=layer_dim[-1])
    out = jax.block_until_ready(out)

    ref = mlp_reference(x, params)
    assert out.shape == (batch, layer_dim[-1])
    err = float(jnp.max(jnp.abs(out - ref)))
    assert jnp.allclose(out, ref, atol=2e-3, rtol=2e-3), \
        f"mismatch vs reference (max abs err {err})"

    print("KERNEL_OK")
</pallas_src>

<mosaic_0001>
module attributes {stable_mosaic.version = 11 : i64} {
  func.func @_hidden_layer_kernel(%arg0: i32, %arg1: i32, %arg2: memref<8x128xbf16, #tpu.memory_space<vmem>>, %arg3: memref<128x128xbf16, #tpu.memory_space<vmem>>, %arg4: memref<1x128xf32, #tpu.memory_space<vmem>>, %arg5: memref<1x128xf32, #tpu.memory_space<vmem>>, %arg6: memref<8x128xbf16, #tpu.memory_space<vmem>>, %arg7: memref<8x128xf32, #tpu.memory_space<vmem>>) attributes {dimension_semantics = [#tpu.dimension_semantics<parallel>, #tpu.dimension_semantics<arbitrary>], iteration_bounds = array<i64: 1, 1>, scalar_prefetch = 0 : i64, scratch_operands = 1 : i64, tpu.core_type = #tpu.core_type<tc>, window_params = [{transform_indices = @transform_0, window_bounds = array<i64: 8, 128>}, {transform_indices = @transform_1, window_bounds = array<i64: 128, 128>}, {transform_indices = @transform_2, window_bounds = array<i64: 1, 128>}, {transform_indices = @transform_3, window_bounds = array<i64: 1, 128>}, {transform_indices = @transform_4, window_bounds = array<i64: 8, 128>}]} {
    %c0_i32 = arith.constant 0 : i32
    %0 = arith.cmpi eq, %arg1, %c0_i32 : i32
    %1 = arith.extui %0 : i1 to i32
    %c0_i32_0 = arith.constant 0 : i32
    %2 = arith.cmpi ne, %1, %c0_i32_0 : i32
    scf.if %2 {
      %cst_10 = arith.constant 0.000000e+00 : f32
      %12 = vector.broadcast %cst_10 : f32 to vector<8x128xf32>
      %c0_11 = arith.constant 0 : index
      %c0_12 = arith.constant 0 : index
      %13 = vector.load %arg7[%c0_11, %c0_12] : memref<8x128xf32, #tpu.memory_space<vmem>>, vector<8x128xf32>
      tpu.vector_store %arg7[%c0_11, %c0_12], %12 {strides = array<i32>} : memref<8x128xf32, #tpu.memory_space<vmem>>, vector<8x128xf32>,
    } else {
    }
    %c0 = arith.constant 0 : index
    %c0_1 = arith.constant 0 : index
    %3 = vector.load %arg7[%c0, %c0_1] : memref<8x128xf32, #tpu.memory_space<vmem>>, vector<8x128xf32>
    %c0_2 = arith.constant 0 : index
    %c0_3 = arith.constant 0 : index
    %4 = vector.load %arg2[%c0_2, %c0_3] : memref<8x128xbf16, #tpu.memory_space<vmem>>, vector<8x128xbf16>
    %c0_4 = arith.constant 0 : index
    %c0_5 = arith.constant 0 : index
    %5 = vector.load %arg3[%c0_4, %c0_5] : memref<128x128xbf16, #tpu.memory_space<vmem>>, vector<128x128xbf16>
    %cst = arith.constant dense<0.000000e+00> : vector<8x128xf32>
    %6 = tpu.matmul %4, %5, %cst {dimension_numbers = #tpu.dot_dimension_numbers<[1], [0], [0], [1], [0, 0, 1, 1], [], []>} : vector<8x128xbf16>, vector<128x128xbf16>, vector<8x128xf32> -> vector<8x128xf32>
    %7 = arith.addf %3, %6 : vector<8x128xf32>
    %c0_6 = arith.constant 0 : index
    %c0_7 = arith.constant 0 : index
    %8 = vector.load %arg7[%c0_6, %c0_7] : memref<8x128xf32, #tpu.memory_space<vmem>>, vector<8x128xf32>
    tpu.vector_store %arg7[%c0_6, %c0_7], %7 {strides = array<i32>} : memref<8x128xf32, #tpu.memory_space<vmem>>, vector<8x128xf32>,
    %c0_i32_8 = arith.constant 0 : i32
    %9 = arith.cmpi eq, %arg1, %c0_i32_8 : i32
    %10 = arith.extui %9 : i1 to i32
    %c0_i32_9 = arith.constant 0 : i32
    %11 = arith.cmpi ne, %10, %c0_i32_9 : i32
    scf.if %11 {
      %c0_10 = arith.constant 0 : index
      %c0_11 = arith.constant 0 : index
      %12 = vector.load %arg7[%c0_10, %c0_11] : memref<8x128xf32, #tpu.memory_space<vmem>>, vector<8x128xf32>
      %cst_12 = arith.constant dense<0.000000e+00> : vector<128xf32>
      %13 = vector.multi_reduction <add>, %12, %cst_12 [0] : vector<8x128xf32> to vector<128xf32>
      %14 = vector.shape_cast %13 : vector<128xf32> to vector<1x128xf32>
      %15 = arith.mulf %12, %12 : vector<8x128xf32>
      %cst_13 = arith.constant dense<0.000000e+00> : vector<128xf32>
      %16 = vector.multi_reduction <add>, %15, %cst_13 [0] : vector<8x128xf32> to vector<128xf32>
      %17 = vector.shape_cast %16 : vector<128xf32> to vector<1x128xf32>
      %cst_14 = arith.constant 1.250000e-01 : f32
      %18 = vector.broadcast %cst_14 : f32 to vector<1x128xf32>
      %19 = arith.mulf %14, %18 : vector<1x128xf32>
      %cst_15 = arith.constant 1.250000e-01 : f32
      %20 = vector.broadcast %cst_15 : f32 to vector<1x128xf32>
      %21 = arith.mulf %17, %20 : vector<1x128xf32>
      %22 = arith.mulf %19, %19 : vector<1x128xf32>
      %23 = arith.subf %21, %22 : vector<1x128xf32>
      %cst_16 = arith.constant 0.000000e+00 : f32
      %24 = vector.broadcast %cst_16 : f32 to vector<1x128xf32>
      %25 = arith.maximumf %23, %24 : vector<1x128xf32>
      %c0_17 = arith.constant 0 : index
      %c0_18 = arith.constant 0 : index
      %26 = vector.load %arg4[%c0_17, %c0_18] : memref<1x128xf32, #tpu.memory_space<vmem>>, vector<1x128xf32>
      %cst_19 = arith.constant 9.99999974E-6 : f32
      %27 = vector.broadcast %cst_19 : f32 to vector<1x128xf32>
      %28 = arith.addf %25, %27 : vector<1x128xf32>
      %29 = math.rsqrt %28 : vector<1x128xf32>
      %30 = arith.mulf %26, %29 : vector<1x128xf32>
      %c0_20 = arith.constant 0 : index
      %c0_21 = arith.constant 0 : index
      %31 = vector.load %arg5[%c0_20, %c0_21] : memref<1x128xf32, #tpu.memory_space<vmem>>, vector<1x128xf32>
      %32 = arith.mulf %19, %30 : vector<1x128xf32>
      %33 = arith.subf %31, %32 : vector<1x128xf32>
      %34 = vector.broadcast %30 : vector<1x128xf32> to vector<8x128xf32>
      %35 = arith.mulf %12, %34 : vector<8x128xf32>
      %36 = vector.broadcast %33 : vector<1x128xf32> to vector<8x128xf32>
      %37 = arith.addf %35, %36 : vector<8x128xf32>
      %cst_22 = arith.constant 0.000000e+00 : f32
      %38 = vector.broadcast %cst_22 : f32 to vector<8x128xf32>
      %39 = arith.maximumf %37, %38 : vector<8x128xf32>
      %40 = arith.truncf %39 : vector<8x128xf32> to vector<8x128xbf16>
      %c0_23 = arith.constant 0 : index
      %c0_24 = arith.constant 0 : index
      %41 = vector.load %arg6[%c0_23, %c0_24] : memref<8x128xbf16, #tpu.memory_space<vmem>>, vector<8x128xbf16>
      tpu.vector_store %arg6[%c0_23, %c0_24], %40 {strides = array<i32>} : memref<8x128xbf16, #tpu.memory_space<vmem>>, vector<8x128xbf16>,
    } else {
    }
    return
  }
  func.func @transform_0(%arg0: i32, %arg1: i32) -> (i32, i32) {
    %c0_i32 = arith.constant 0 : i32
    %c0_i32_0 = arith.constant 0 : i32
    return %c0_i32, %arg1 : i32, i32
  }
  func.func @transform_1(%arg0: i32, %arg1: i32) -> (i32, i32) {
    %c0_i32 = arith.constant 0 : i32
    return %arg1, %arg0 : i32, i32
  }
  func.func @transform_2(%arg0: i32, %arg1: i32) -> (i32, i32) {
    %c0_i32 = arith.constant 0 : i32
    %c0_i32_0 = arith.constant 0 : i32
    return %c0_i32, %arg0 : i32, i32
  }
  func.func @transform_3(%arg0: i32, %arg1: i32) -> (i32, i32) {
    %c0_i32 = arith.constant 0 : i32
    %c0_i32_0 = arith.constant 0 : i32
    return %c0_i32, %arg0 : i32, i32
  }
  func.func @transform_4(%arg0: i32, %arg1: i32) -> (i32, i32) {
    %c0_i32 = arith.constant 0 : i32
    %c0_i32_0 = arith.constant 0 : i32
    return %c0_i32, %arg0 : i32, i32
  }
}

module attributes {stable_mosaic.version = 11 : i64} {
  func.func @_final_layer_kernel(%arg0: i32, %arg1: i32, %arg2: memref<8x128xbf16, #tpu.memory_space<vmem>>, %arg3: memref<128x128xbf16, #tpu.memory_space<vmem>>, %arg4: memref<1x128xf32, #tpu.memory_space<vmem>>, %arg5: memref<8x128xf32, #tpu.memory_space<vmem>>, %arg6: memref<8x128xf32, #tpu.memory_space<vmem>>) attributes {dimension_semantics = [#tpu.dimension_semantics<parallel>, #tpu.dimension_semantics<arbitrary>], iteration_bounds = array<i64: 1, 1>, scalar_prefetch = 0 : i64, scratch_operands = 1 : i64, tpu.core_type = #tpu.core_type<tc>, window_params = [{transform_indices = @transform_0, window_bounds = array<i64: 8, 128>}, {transform_indices = @transform_1, window_bounds = array<i64: 128, 128>}, {transform_indices = @transform_2, window_bounds = array<i64: 1, 128>}, {transform_indices = @transform_3, window_bounds = array<i64: 8, 128>}]} {
    %c0_i32 = arith.constant 0 : i32
    %0 = arith.cmpi eq, %arg1, %c0_i32 : i32
    %1 = arith.extui %0 : i1 to i32
    %c0_i32_0 = arith.constant 0 : i32
    %2 = arith.cmpi ne, %1, %c0_i32_0 : i32
    scf.if %2 {
      %cst_10 = arith.constant 0.000000e+00 : f32
      %12 = vector.broadcast %cst_10 : f32 to vector<8x128xf32>
      %c0_11 = arith.constant 0 : index
      %c0_12 = arith.constant 0 : index
      %13 = vector.load %arg6[%c0_11, %c0_12] : memref<8x128xf32, #tpu.memory_space<vmem>>, vector<8x128xf32>
      tpu.vector_store %arg6[%c0_11, %c0_12], %12 {strides = array<i32>} : memref<8x128xf32, #tpu.memory_space<vmem>>, vector<8x128xf32>,
    } else {
    }
    %c0 = arith.constant 0 : index
    %c0_1 = arith.constant 0 : index
    %3 = vector.load %arg6[%c0, %c0_1] : memref<8x128xf32, #tpu.memory_space<vmem>>, vector<8x128xf32>
    %c0_2 = arith.constant 0 : index
    %c0_3 = arith.constant 0 : index
    %4 = vector.load %arg2[%c0_2, %c0_3] : memref<8x128xbf16, #tpu.memory_space<vmem>>, vector<8x128xbf16>
    %c0_4 = arith.constant 0 : index
    %c0_5 = arith.constant 0 : index
    %5 = vector.load %arg3[%c0_4, %c0_5] : memref<128x128xbf16, #tpu.memory_space<vmem>>, vector<128x128xbf16>
    %cst = arith.constant dense<0.000000e+00> : vector<8x128xf32>
    %6 = tpu.matmul %4, %5, %cst {dimension_numbers = #tpu.dot_dimension_numbers<[1], [0], [0], [1], [0, 0, 1, 1], [], []>} : vector<8x128xbf16>, vector<128x128xbf16>, vector<8x128xf32> -> vector<8x128xf32>
    %7 = arith.addf %3, %6 : vector<8x128xf32>
    %c0_6 = arith.constant 0 : index
    %c0_7 = arith.constant 0 : index
    %8 = vector.load %arg6[%c0_6, %c0_7] : memref<8x128xf32, #tpu.memory_space<vmem>>, vector<8x128xf32>
    tpu.vector_store %arg6[%c0_6, %c0_7], %7 {strides = array<i32>} : memref<8x128xf32, #tpu.memory_space<vmem>>, vector<8x128xf32>,
    %c0_i32_8 = arith.constant 0 : i32
    %9 = arith.cmpi eq, %arg1, %c0_i32_8 : i32
    %10 = arith.extui %9 : i1 to i32
    %c0_i32_9 = arith.constant 0 : i32
    %11 = arith.cmpi ne, %10, %c0_i32_9 : i32
    scf.if %11 {
      %c0_10 = arith.constant 0 : index
      %c0_11 = arith.constant 0 : index
      %12 = vector.load %arg6[%c0_10, %c0_11] : memref<8x128xf32, #tpu.memory_space<vmem>>, vector<8x128xf32>
      %c0_12 = arith.constant 0 : index
      %c0_13 = arith.constant 0 : index
      %13 = vector.load %arg4[%c0_12, %c0_13] : memref<1x128xf32, #tpu.memory_space<vmem>>, vector<1x128xf32>
      %14 = vector.broadcast %13 : vector<1x128xf32> to vector<8x128xf32>
      %15 = arith.addf %12, %14 : vector<8x128xf32>
      %c0_14 = arith.constant 0 : index
      %c0_15 = arith.constant 0 : index
      %16 = vector.load %arg5[%c0_14, %c0_15] : memref<8x128xf32, #tpu.memory_space<vmem>>, vector<8x128xf32>
      tpu.vector_store %arg5[%c0_14, %c0_15], %15 {strides = array<i32>} : memref<8x128xf32, #tpu.memory_space<vmem>>, vector<8x128xf32>,
    } else {
    }
    return
  }
  func.func @transform_0(%arg0: i32, %arg1: i32) -> (i32, i32) {
    %c0_i32 = arith.constant 0 : i32
    %c0_i32_0 = arith.constant 0 : i32
    return %c0_i32, %arg1 : i32, i32
  }
  func.func @transform_1(%arg0: i32, %arg1: i32) -> (i32, i32) {
    %c0_i32 = arith.constant 0 : i32
    return %arg1, %arg0 : i32, i32
  }
  func.func @transform_2(%arg0: i32, %arg1: i32) -> (i32, i32) {
    %c0_i32 = arith.constant 0 : i32
    %c0_i32_0 = arith.constant 0 : i32
    return %c0_i32, %arg0 : i32, i32
  }
  func.func @transform_3(%arg0: i32, %arg1: i32) -> (i32, i32) {
    %c0_i32 = arith.constant 0 : i32
    %c0_i32_0 = arith.constant 0 : i32
    return %c0_i32, %arg0 : i32, i32
  }
}

</mosaic_0001>

<bundles_post_ra>
// kernel: mlp_forward.3
= control target key start
LH: loop header
LB: loop body
LE: loop exit
PB: predicated region body
PF: predicated region fallthrough
CT: control target
= control target key end

     0   :  { %9 = vsyncpa [#allocation4], 0  ;;  %s244_s18 = smov [#allocation3]   ;;  %s245_s20 = smov 64   ;;  %s287_s0 = inlined_call_operand.vmem [shape: bf16[8,128], index: 0, kind: input, shape index: {}]   ;;  %s288_s1 = inlined_call_operand.hbm [shape: bf16[128,128], index: 1, kind: input, shape index: {}]   ;;  %s289_s2 = inlined_call_operand.vmem [shape: f32[1,128], index: 2, kind: input, shape index: {}]   ;;  %s290_s3 = inlined_call_operand.vmem [shape: f32[1,128], index: 3, kind: input, shape index: {}]   ;;  %s291_s4 = inlined_call_operand.vmem [shape: bf16[8,128], index: 4, kind: output, shape index: {}]  }
   0x1   :  { %s16_s17 = sshll.u32 %s288_s1, 4  ;;  %s18_s19 = sshll.u32 %s244_s18, 4  ;;  %s17_s17 = int_to_ptr.hbm [resolvable:$true] %s16_s17  ;;  %s19_s19 = int_to_ptr.vmem [resolvable:$true] %s18_s19 }
   0x2   :  { %s246_s21 = smov 4  }
   0x3   :  { %24 = dma.hbm_to_vmem [thread:$0]  %s17_s17, 1024, %s19_s19, [#allocation4], %s245_s20, %s245_s20, %s246_s21  }
   0x4   :  { %242 = dma.done.wait [#allocation4], 1024  }
   0x5   :  { %243 = vsyncadd [#allocation4], 4294966272  ;;  %v212_v0 = vld [vmem:[#allocation3 + $0x38] sm:$0xff]  ;;  %v211_v1 = vld [vmem:[#allocation3 + $0x30] sm:$0xff] }
   0x6   :  { %104 = vmatpush.bf16.msra.mxu0 %v212_v0  ;;  %v210_v2 = vld [vmem:[#allocation3 + $0x28] sm:$0xff]  ;;  %v209_v3 = vld [vmem:[#allocation3 + $0x20] sm:$0xff]  ;;  %v208_v4 = vld [vmem:[#allocation3 + $0x18] sm:$0xff] }
   0x7   :  { %v207_v5 = vld [vmem:[#allocation3 + $0x10] sm:$0xff]  ;;  %v206_v6 = vld [vmem:[#allocation3 + $0x8] sm:$0xff]  ;;  %v205_v7 = vld [vmem:[#allocation3] sm:$0xff] }
   0x8   :  { %v39_v8 = vld [vmem:[%s287_s0] sm:$0xf] }
   0x9   :  { %v141_v35 = vld [vmem:[%s289_s2] sm:$0x1] }
   0xa   :  { %105 = vmatpush.bf16.msra.mxu0 %v211_v1  ;;  %v154_v39 = vld [vmem:[%s290_s3] sm:$0x1] }
   0xe   :  { %106 = vmatpush.bf16.msra.mxu0 %v210_v2 }
  0x12   :  { %107 = vmatpush.bf16.msra.mxu0 %v209_v3 }
  0x16   :  { %108 = vmatpush.bf16.msra.mxu0 %v208_v4 }
  0x1a   :  { %109 = vmatpush.bf16.msra.mxu0 %v207_v5 }
  0x1e   :  { %110 = vmatpush.bf16.msra.mxu0 %v206_v6 }
  0x22   :  { %111 = vmatpush.bf16.msra.mxu0 %v205_v7 }
  0x25   :  { %112 = vmatmul.bf16.vlgmr.msra.gmra.mxu0 %v39_v8 }
  0xa2   :  { %v113_v9 = vpop.f32.mrf.mxu0 }
  0xa3   :  { %v123_v10 = vrot.slane %v113_v9, 4  ;;  %v129_v11 = vmul.f32 %v113_v9, %v113_v9 }
  0xa5   :  { %v124_v12 = vadd.f32 %v123_v10, %v113_v9  ;;  %v130_v13 = vrot.slane %v129_v11, 4 }
  0xa7   :  { %v125_v14 = vrot.slane %v124_v12, 2  ;;  %v131_v15 = vadd.f32 %v130_v13, %v129_v11 }
  0xa9   :  { %v126_v16 = vadd.f32 %v125_v14, %v124_v12  ;;  %v132_v17 = vrot.slane %v131_v15, 2 }
  0xaa   :  { %v115_v18 = vpop.f32.mrf.mxu0 }
  0xab   :  { %v127_v19 = vrot.slane %v126_v16, 1  ;;  %v133_v20 = vadd.f32 %v132_v17, %v131_v15 }
  0xad   :  { %v128_v21 = vadd.f32 %v127_v19, %v126_v16  ;;  %v134_v22 = vrot.slane %v133_v20, 1 }
  0xaf   :  { %v135_v23 = vadd.f32 %v134_v22, %v133_v20  ;;  %v136_v24 = vmul.f32 0.125, %v128_v21 }
  0xb1   :  { %v137_v25 = vmul.f32 0.125, %v135_v23  ;;  %v138_v26 = vmul.f32 %v136_v24, %v136_v24 }
  0xb3   :  { %v139_v27 = vsub.f32 %v137_v25, %v138_v26 }
  0xb5   :  { %v140_v28 = vmax.f32 %v139_v27, 0.0 }
  0xb7   :  { %v142_v29 = vadd.f32 1e-05, %v140_v28 }
  0xb9   :  { %216 = vrsqrt.f32 %v142_v29  ;;  %vm149_vm1 = vweird.f32 %v142_v29 }
  0xbf   :  { %v217_v30 = vpop.eup %216 }
  0xc0   :  { %v144_v31 = vmul.f32 %v217_v30, %v142_v29  ;;  %vm150_vm0 = vweird.f32 %v217_v30 }
  0xc1   :  { %vm151_vm2 = vmor %vm149_vm1, %vm150_vm0 }
  0xc2   :  { %v145_v32 = vmul.f32 %v217_v30, %v144_v31 }
  0xc4   :  { %v146_v33 = vmul.f32 0.5, %v145_v32 }
  0xc6   :  { %v147_v34 = vsub.f32 1.5, %v146_v33 }
  0xc8   :  { %v148_v36 = vmul.f32 %v217_v30, %v147_v34 }
  0xca   :  { %v152_v37 = vsel %vm151_vm2, %v217_v30, %v148_v36 }
  0xcb   :  { %v153_v38 = vmul.f32 %v152_v37, %v141_v35 }
  0xcd   :  { %v155_v40 = vmul.f32 %v153_v38, %v136_v24  ;;  %v158_v41 = vperm.slane %v153_v38, 0 }
  0xcf   :  { %v156_v42 = vsub.f32 %v154_v39, %v155_v40  ;;  %v160_v43 = vmul.f32 %v158_v41, %v113_v9 }
  0xd1   :  { %v162_v44 = vperm.slane %v156_v42, 0 }
  0xd3   :  { %v164_v45 = vadd.f32 %v162_v44, %v160_v43 }
  0xd5   :  { %v165_v46 = vmax.f32 %v164_v45, 0.0 }
  0xd7   :  { %v166_v47 = vpack.c.bf16 %v165_v46, %v165_v46 }
  0xd9   :  { %167 = vst [vmem:[%s291_s4] sm:$0xf] %v166_v47 }
  0xda   :  { %172 = vsyncpa [#allocation4], 1 }

// kernel: mlp_forward.5
= control target key start
LH: loop header
LB: loop body
LE: loop exit
PB: predicated region body
PF: predicated region fallthrough
CT: control target
= control target key end

     0   :  { %8 = vsyncpa [#allocation4], 0  ;;  %s277_s0 = inlined_call_operand.vmem [shape: bf16[8,128], index: 0, kind: input, shape index: {}]   ;;  %s278_s1 = inlined_call_operand.hbm [shape: bf16[128,128], index: 1, kind: input, shape index: {}]   ;;  %s279_s2 = inlined_call_operand.vmem [shape: f32[1,128], index: 2, kind: input, shape index: {}]   ;;  %s280_s3 = inlined_call_operand.hbm [shape: f32[8,128], index: 3, kind: output, shape index: {}]  }
   0x1   :  { %9 = vsyncpa [#allocation5], 0  ;;  %s16_s14 = sshll.u32 %s278_s1, 4  ;;  %s241_s15 = smov [#allocation3]   ;;  %s17_s14 = int_to_ptr.hbm [resolvable:$true] %s16_s14 }
   0x2   :  { %s18_s16 = sshll.u32 %s241_s15, 4  ;;  %s242_s17 = smov 64   ;;  %s19_s16 = int_to_ptr.vmem [resolvable:$true] %s18_s16 }
   0x3   :  { %s243_s18 = smov 4  }
   0x4   :  { %24 = dma.hbm_to_vmem [thread:$0]  %s17_s14, 1024, %s19_s16, [#allocation4], %s242_s17, %s242_s17, %s243_s18  }
   0x5   :  { %237 = dma.done.wait [#allocation4], 1024  }
   0x6   :  { %238 = vsyncadd [#allocation4], 4294966272  ;;  %v183_v0 = vld [vmem:[#allocation3 + $0x38] sm:$0xff]  ;;  %v182_v1 = vld [vmem:[#allocation3 + $0x30] sm:$0xff]  ;;  %s244_s22 = smov [#allocation6]   ;;  %s134_s26 = sshll.u32 %s280_s3, 4  ;;  %s135_s26 = int_to_ptr.hbm [resolvable:$true] %s134_s26 }
   0x7   :  { %102 = vmatpush.bf16.msra.mxu0 %v183_v0  ;;  %v181_v2 = vld [vmem:[#allocation3 + $0x28] sm:$0xff]  ;;  %v180_v3 = vld [vmem:[#allocation3 + $0x20] sm:$0xff]  ;;  %v179_v4 = vld [vmem:[#allocation3 + $0x18] sm:$0xff]  ;;  %s132_s23 = sshll.u32 %s244_s22, 4  ;;  %s133_s23 = int_to_ptr.vmem [resolvable:$true] %s132_s23 }
   0x8   :  { %v178_v5 = vld [vmem:[#allocation3 + $0x10] sm:$0xff]  ;;  %v177_v6 = vld [vmem:[#allocation3 + $0x8] sm:$0xff]  ;;  %v176_v7 = vld [vmem:[#allocation3] sm:$0xff] }
   0x9   :  { %v37_v8 = vld [vmem:[%s277_s0] sm:$0xf] }
   0xa   :  { %v188_v9 = vld [vmem:[%s279_s2] ss:$0 sm:$0xff] }
   0xb   :  { %103 = vmatpush.bf16.msra.mxu0 %v182_v1 }
   0xf   :  { %104 = vmatpush.bf16.msra.mxu0 %v181_v2 }
  0x13   :  { %105 = vmatpush.bf16.msra.mxu0 %v180_v3 }
  0x17   :  { %106 = vmatpush.bf16.msra.mxu0 %v179_v4 }
  0x1b   :  { %107 = vmatpush.bf16.msra.mxu0 %v178_v5 }
  0x1f   :  { %108 = vmatpush.bf16.msra.mxu0 %v177_v6 }
  0x23   :  { %109 = vmatpush.bf16.msra.mxu0 %v176_v7 }
  0x26   :  { %110 = vmatmul.bf16.vlgmr.msra.gmra.mxu0 %v37_v8 }
  0xa3   :  { %v111_v10 = vpop.f32.mrf.mxu0 }
  0xa4   :  { %v125_v11 = vadd.f32 %v188_v9, %v111_v10 }
  0xa6   :  { %126 = vst [vmem:[#allocation6] sm:$0xff] %v125_v11 }
  0xa7   :  { %137 = dma.vmem_to_hbm [thread:$0]  %s133_s23, 128, %s135_s26, [#allocation5]  }
  0xab   :  { %v113_v12 = vpop.f32.mrf.mxu0 }
  0xac   :  { %239 = dma.done.wait [#allocation5], 128  }
  0xad   :  { %240 = vsyncadd [#allocation5], 4294967168 }
  0xae   :  { %142 = vsyncpa [#allocation4], 1 }
  0xaf   :  { %143 = vsyncpa [#allocation5], 1 }

</bundles_post_ra>
